<compile_context>
chip_gen: v5e
topology: v5e:2x2
jax: 0.10.0
libtpu: 0.0.40
codegen_flags: <defaults>
</compile_context>

<pallas_src>
import jax
import jax.numpy as jnp
from jax import lax
from jax.experimental import pallas as pl
from jax.experimental.pallas import tpu as pltpu


def _eeg_lstm_fc_kernel(x_ref, wih_ref, whh_ref, b_ref, wfc_ref, bfc_ref,
                        out_ref, gx_scr):
    """Whole forward pass in one invocation.

    x_ref   : (T*B, I)  time-major flattened input
    wih_ref : (I, 4H)   W_ih^T
    whh_ref : (H, 4H)   W_hh^T
    b_ref   : (1, 4H)   b_ih + b_hh
    wfc_ref : (H, C)    W_fc^T
    bfc_ref : (1, C)    b_fc
    out_ref : (B, C)    logits
    gx_scr  : (T*B, 4H) VMEM scratch holding the hoisted input projection
    """
    B = out_ref.shape[0]
    H = whh_ref.shape[0]
    T = x_ref.shape[0] // B

    # ---- Prologue: hoist the input projection out of the serial recurrence ----
    # One sublane-dense (T*B, I) x (I, 4H) matmul replaces T tiny per-step matmuls.
    gx_scr[...] = (jnp.dot(x_ref[...], wih_ref[...],
                           preferred_element_type=jnp.float32)
                   + b_ref[...])

    whh = whh_ref[...]  # (H, 4H); load once, reused every step

    def step(t, carry):
        h, c = carry
        row = pl.multiple_of(t * B, B)
        # Precomputed x-projection rows for time step t (contiguous, time-major)
        gates = gx_scr[pl.ds(row, B), :] + jnp.dot(
            h, whh, preferred_element_type=jnp.float32)        # (B, 4H)
        # PyTorch nn.LSTM gate order: [i, f, g, o]
        i_g = jax.nn.sigmoid(gates[:, 0 * H:1 * H])
        f_g = jax.nn.sigmoid(gates[:, 1 * H:2 * H])
        g_g = jnp.tanh(gates[:, 2 * H:3 * H])
        o_g = jax.nn.sigmoid(gates[:, 3 * H:4 * H])
        c_new = f_g * c + i_g * g_g
        h_new = o_g * jnp.tanh(c_new)
        return h_new, c_new

    h0 = jnp.zeros((B, H), jnp.float32)
    c0 = jnp.zeros((B, H), jnp.float32)
    # State carried in vregs (no per-step VMEM round-trip). Fully unroll small T.
    h_T, _ = lax.fori_loop(0, T, step, (h0, c0), unroll=(T <= 32))

    # last_output = h_T ; dropout(p=0.3) is identity in eval mode ; fc layer
    # TODO(synk): training-mode dropout mask (pltpu.prng_seed/prng_random_bits) not implemented.
    out_ref[...] = (jnp.dot(h_T, wfc_ref[...],
                            preferred_element_type=jnp.float32)
                    + bfc_ref[...]).astype(out_ref.dtype)


def eeg_model_forward(x_btd, params):
    """x_btd: (B, T, I) float32 (batch_first, like PyTorch). Returns (B, C) logits."""
    B, T, I = x_btd.shape
    H = params["whh_t"].shape[0]
    C = params["wfc_t"].shape[1]

    # One cheap layout op: time-major flatten so the prologue matmul covers all
    # time steps and per-step rows of the projection are contiguous.
    x_tm = jnp.transpose(x_btd, (1, 0, 2)).reshape(T * B, I)

    def full(shape):
        return pl.BlockSpec(shape, lambda _: (0,) * len(shape))

    return pl.pallas_call(
        _eeg_lstm_fc_kernel,
        out_shape=jax.ShapeDtypeStruct((B, C), jnp.float32),
        grid=(1,),
        in_specs=[
            full((T * B, I)),        # x (time-major, flattened)
            full((I, 4 * H)),        # W_ih^T
            full((H, 4 * H)),        # W_hh^T
            full((1, 4 * H)),        # b_ih + b_hh
            full((H, C)),            # W_fc^T
            full((1, C)),            # b_fc
        ],
        out_specs=full((B, C)),
        scratch_shapes=[pltpu.VMEM((T * B, 4 * H), jnp.float32)],
        compiler_params=pltpu.CompilerParams(
            dimension_semantics=("arbitrary",)),
    )(x_tm, params["wih_t"], params["whh_t"], params["bias"],
      params["wfc_t"], params["bfc"])


def init_params(key, input_size, hidden_size, num_classes):
    """Deterministic synthetic parameters matching nn.LSTM + nn.Linear shapes."""
    k1, k2, k3, k4, k5, k6 = jax.random.split(key, 6)
    s = 1.0 / jnp.sqrt(jnp.float32(hidden_size))
    u = lambda k, shape: jax.random.uniform(k, shape, jnp.float32, -s, s)
    # PyTorch stores weight_ih (4H, I) / weight_hh (4H, H); we keep transposed
    # copies so the kernel computes x @ W_ih^T and h @ W_hh^T directly.
    wih_t = u(k1, (input_size, 4 * hidden_size))
    whh_t = u(k2, (hidden_size, 4 * hidden_size))
    bias = u(k3, (1, 4 * hidden_size)) + u(k4, (1, 4 * hidden_size))  # b_ih + b_hh
    wfc_t = u(k5, (hidden_size, num_classes))
    bfc = u(k6, (1, num_classes))
    return {"wih_t": wih_t, "whh_t": whh_t, "bias": bias,
            "wfc_t": wfc_t, "bfc": bfc}


def reference_forward(x_btd, params):
    """Pure-JAX reference (same math) for a sanity check."""
    B, T, I = x_btd.shape
    H = params["whh_t"].shape[0]
    h = jnp.zeros((B, H), jnp.float32)
    c = jnp.zeros((B, H), jnp.float32)
    for t in range(T):
        g = x_btd[:, t, :] @ params["wih_t"] + h @ params["whh_t"] + params["bias"]
        i_g = jax.nn.sigmoid(g[:, 0 * H:1 * H])
        f_g = jax.nn.sigmoid(g[:, 1 * H:2 * H])
        g_g = jnp.tanh(g[:, 2 * H:3 * H])
        o_g = jax.nn.sigmoid(g[:, 3 * H:4 * H])
        c = f_g * c + i_g * g_g
        h = o_g * jnp.tanh(c)
    return h @ params["wfc_t"] + params["bfc"]


if __name__ == "__main__":
    B, T, INPUT, HIDDEN, CLASSES = 2, 8, 16, 32, 4

    key = jax.random.PRNGKey(0)
    kx, kp = jax.random.split(key)
    x = jax.random.normal(kx, (B, T, INPUT), jnp.float32)  # (batch, seq, features)
    params = init_params(kp, INPUT, HIDDEN, CLASSES)

    out = eeg_model_forward(x, params)
    out = jax.block_until_ready(out)

    ref = reference_forward(x, params)
    assert out.shape == (B, CLASSES)
    assert jnp.allclose(out, ref, atol=1e-3, rtol=1e-3), "mismatch vs reference"

    print("KERNEL_OK")
</pallas_src>

<mosaic_0001>
module attributes {stable_mosaic.version = 11 : i64} {
  func.func @_eeg_lstm_fc_kernel(%arg0: i32, %arg1: memref<16x16xf32, #tpu.memory_space<vmem>>, %arg2: memref<16x128xf32, #tpu.memory_space<vmem>>, %arg3: memref<32x128xf32, #tpu.memory_space<vmem>>, %arg4: memref<1x128xf32, #tpu.memory_space<vmem>>, %arg5: memref<32x4xf32, #tpu.memory_space<vmem>>, %arg6: memref<1x4xf32, #tpu.memory_space<vmem>>, %arg7: memref<2x4xf32, #tpu.memory_space<vmem>>, %arg8: memref<16x128xf32, #tpu.memory_space<vmem>>) attributes {dimension_semantics = [#tpu.dimension_semantics<arbitrary>], iteration_bounds = array<i64: 1>, scalar_prefetch = 0 : i64, scratch_operands = 1 : i64, tpu.core_type = #tpu.core_type<tc>, window_params = [{pipeline_mode = #tpu.pipeline_mode<synchronous>, transform_indices = @transform_0, window_bounds = array<i64: 16, 16>}, {pipeline_mode = #tpu.pipeline_mode<synchronous>, transform_indices = @transform_1, window_bounds = array<i64: 16, 128>}, {pipeline_mode = #tpu.pipeline_mode<synchronous>, transform_indices = @transform_2, window_bounds = array<i64: 32, 128>}, {pipeline_mode = #tpu.pipeline_mode<synchronous>, transform_indices = @transform_3, window_bounds = array<i64: 1, 128>}, {pipeline_mode = #tpu.pipeline_mode<synchronous>, transform_indices = @transform_4, window_bounds = array<i64: 32, 4>}, {pipeline_mode = #tpu.pipeline_mode<synchronous>, transform_indices = @transform_5, window_bounds = array<i64: 1, 4>}, {pipeline_mode = #tpu.pipeline_mode<synchronous>, transform_indices = @transform_6, window_bounds = array<i64: 2, 4>}]} {
    %c0 = arith.constant 0 : index
    %c0_0 = arith.constant 0 : index
    %0 = vector.load %arg1[%c0, %c0_0] : memref<16x16xf32, #tpu.memory_space<vmem>>, vector<16x16xf32>
    %c0_1 = arith.constant 0 : index
    %c0_2 = arith.constant 0 : index
    %1 = vector.load %arg2[%c0_1, %c0_2] : memref<16x128xf32, #tpu.memory_space<vmem>>, vector<16x128xf32>
    %cst = arith.constant dense<0.000000e+00> : vector<16x128xf32>
    %2 = tpu.matmul %0, %1, %cst {dimension_numbers = #tpu.dot_dimension_numbers<[1], [0], [0], [1], [0, 0, 1, 1], [], []>} : vector<16x16xf32>, vector<16x128xf32>, vector<16x128xf32> -> vector<16x128xf32>
    %c0_3 = arith.constant 0 : index
    %c0_4 = arith.constant 0 : index
    %3 = vector.load %arg4[%c0_3, %c0_4] : memref<1x128xf32, #tpu.memory_space<vmem>>, vector<1x128xf32>
    %4 = vector.broadcast %3 : vector<1x128xf32> to vector<16x128xf32>
    %5 = arith.addf %2, %4 : vector<16x128xf32>
    %c0_5 = arith.constant 0 : index
    %c0_6 = arith.constant 0 : index
    %6 = vector.load %arg8[%c0_5, %c0_6] : memref<16x128xf32, #tpu.memory_space<vmem>>, vector<16x128xf32>
    tpu.vector_store %arg8[%c0_5, %c0_6], %5 {strides = array<i32>} : memref<16x128xf32, #tpu.memory_space<vmem>>, vector<16x128xf32>,
    %c0_7 = arith.constant 0 : index
    %c0_8 = arith.constant 0 : index
    %7 = vector.load %arg3[%c0_7, %c0_8] : memref<32x128xf32, #tpu.memory_space<vmem>>, vector<32x128xf32>
    %cst_9 = arith.constant 0.000000e+00 : f32
    %8 = vector.broadcast %cst_9 : f32 to vector<2x32xf32>
    %cst_10 = arith.constant 0.000000e+00 : f32
    %9 = vector.broadcast %cst_10 : f32 to vector<2x32xf32>
    %c0_i32 = arith.constant 0 : i32
    %c2_i32 = arith.constant 2 : i32
    %10 = arith.muli %c0_i32, %c2_i32 : i32
    %11 = tpu.assume_multiple %10, 2 : i32
    %12 = arith.index_cast %11 : i32 to index
    %c0_11 = arith.constant 0 : index
    %13 = vector.load %arg8[%12, %c0_11] : memref<16x128xf32, #tpu.memory_space<vmem>>, vector<2x128xf32>
    %cst_12 = arith.constant dense<0.000000e+00> : vector<2x128xf32>
    %14 = tpu.matmul %8, %7, %cst_12 {dimension_numbers = #tpu.dot_dimension_numbers<[1], [0], [0], [1], [0, 0, 1, 1], [], []>} : vector<2x32xf32>, vector<32x128xf32>, vector<2x128xf32> -> vector<2x128xf32>
    %15 = arith.addf %13, %14 : vector<2x128xf32>
    %16 = vector.extract_strided_slice %15 {offsets = [0, 0], sizes = [2, 32], strides = [1, 1]} : vector<2x128xf32> to vector<2x32xf32>
    %17 = arith.negf %16 : vector<2x32xf32>
    %18 = math.exp %17 : vector<2x32xf32>
    %cst_13 = arith.constant 1.000000e+00 : f32
    %19 = vector.broadcast %cst_13 : f32 to vector<2x32xf32>
    %20 = arith.addf %19, %18 : vector<2x32xf32>
    %21 = arith.divf %19, %20 : vector<2x32xf32>
    %22 = vector.extract_strided_slice %15 {offsets = [0, 32], sizes = [2, 32], strides = [1, 1]} : vector<2x128xf32> to vector<2x32xf32>
    %23 = arith.negf %22 : vector<2x32xf32>
    %24 = math.exp %23 : vector<2x32xf32>
    %cst_14 = arith.constant 1.000000e+00 : f32
    %25 = vector.broadcast %cst_14 : f32 to vector<2x32xf32>
    %26 = arith.addf %25, %24 : vector<2x32xf32>
    %27 = arith.divf %25, %26 : vector<2x32xf32>
    %28 = vector.extract_strided_slice %15 {offsets = [0, 64], sizes = [2, 32], strides = [1, 1]} : vector<2x128xf32> to vector<2x32xf32>
    %29 = math.tanh %28 : vector<2x32xf32>
    %30 = vector.extract_strided_slice %15 {offsets = [0, 96], sizes = [2, 32], strides = [1, 1]} : vector<2x128xf32> to vector<2x32xf32>
    %31 = arith.negf %30 : vector<2x32xf32>
    %32 = math.exp %31 : vector<2x32xf32>
    %cst_15 = arith.constant 1.000000e+00 : f32
    %33 = vector.broadcast %cst_15 : f32 to vector<2x32xf32>
    %34 = arith.addf %33, %32 : vector<2x32xf32>
    %35 = arith.divf %33, %34 : vector<2x32xf32>
    %36 = arith.mulf %27, %9 : vector<2x32xf32>
    %37 = arith.mulf %21, %29 : vector<2x32xf32>
    %38 = arith.addf %36, %37 : vector<2x32xf32>
    %39 = math.tanh %38 : vector<2x32xf32>
    %40 = arith.mulf %35, %39 : vector<2x32xf32>
    %c1_i32 = arith.constant 1 : i32
    %c2_i32_16 = arith.constant 2 : i32
    %41 = arith.muli %c1_i32, %c2_i32_16 : i32
    %42 = tpu.assume_multiple %41, 2 : i32
    %43 = arith.index_cast %42 : i32 to index
    %c0_17 = arith.constant 0 : index
    %44 = vector.load %arg8[%43, %c0_17] : memref<16x128xf32, #tpu.memory_space<vmem>>, vector<2x128xf32>
    %cst_18 = arith.constant dense<0.000000e+00> : vector<2x128xf32>
    %45 = tpu.matmul %40, %7, %cst_18 {dimension_numbers = #tpu.dot_dimension_numbers<[1], [0], [0], [1], [0, 0, 1, 1], [], []>} : vector<2x32xf32>, vector<32x128xf32>, vector<2x128xf32> -> vector<2x128xf32>
    %46 = arith.addf %44, %45 : vector<2x128xf32>
    %47 = vector.extract_strided_slice %46 {offsets = [0, 0], sizes = [2, 32], strides = [1, 1]} : vector<2x128xf32> to vector<2x32xf32>
    %48 = arith.negf %47 : vector<2x32xf32>
    %49 = math.exp %48 : vector<2x32xf32>
    %cst_19 = arith.constant 1.000000e+00 : f32
    %50 = vector.broadcast %cst_19 : f32 to vector<2x32xf32>
    %51 = arith.addf %50, %49 : vector<2x32xf32>
    %52 = arith.divf %50, %51 : vector<2x32xf32>
    %53 = vector.extract_strided_slice %46 {offsets = [0, 32], sizes = [2, 32], strides = [1, 1]} : vector<2x128xf32> to vector<2x32xf32>
    %54 = arith.negf %53 : vector<2x32xf32>
    %55 = math.exp %54 : vector<2x32xf32>
    %cst_20 = arith.constant 1.000000e+00 : f32
    %56 = vector.broadcast %cst_20 : f32 to vector<2x32xf32>
    %57 = arith.addf %56, %55 : vector<2x32xf32>
    %58 = arith.divf %56, %57 : vector<2x32xf32>
    %59 = vector.extract_strided_slice %46 {offsets = [0, 64], sizes = [2, 32], strides = [1, 1]} : vector<2x128xf32> to vector<2x32xf32>
    %60 = math.tanh %59 : vector<2x32xf32>
    %61 = vector.extract_strided_slice %46 {offsets = [0, 96], sizes = [2, 32], strides = [1, 1]} : vector<2x128xf32> to vector<2x32xf32>
    %62 = arith.negf %61 : vector<2x32xf32>
    %63 = math.exp %62 : vector<2x32xf32>
    %cst_21 = arith.constant 1.000000e+00 : f32
    %64 = vector.broadcast %cst_21 : f32 to vector<2x32xf32>
    %65 = arith.addf %64, %63 : vector<2x32xf32>
    %66 = arith.divf %64, %65 : vector<2x32xf32>
    %67 = arith.mulf %58, %38 : vector<2x32xf32>
    %68 = arith.mulf %52, %60 : vector<2x32xf32>
    %69 = arith.addf %67, %68 : vector<2x32xf32>
    %70 = math.tanh %69 : vector<2x32xf32>
    %71 = arith.mulf %66, %70 : vector<2x32xf32>
    %c2_i32_22 = arith.constant 2 : i32
    %c2_i32_23 = arith.constant 2 : i32
    %72 = arith.muli %c2_i32_22, %c2_i32_23 : i32
    %73 = tpu.assume_multiple %72, 2 : i32
    %74 = arith.index_cast %73 : i32 to index
    %c0_24 = arith.constant 0 : index
    %75 = vector.load %arg8[%74, %c0_24] : memref<16x128xf32, #tpu.memory_space<vmem>>, vector<2x128xf32>
    %cst_25 = arith.constant dense<0.000000e+00> : vector<2x128xf32>
    %76 = tpu.matmul %71, %7, %cst_25 {dimension_numbers = #tpu.dot_dimension_numbers<[1], [0], [0], [1], [0, 0, 1, 1], [], []>} : vector<2x32xf32>, vector<32x128xf32>, vector<2x128xf32> -> vector<2x128xf32>
    %77 = arith.addf %75, %76 : vector<2x128xf32>
    %78 = vector.extract_strided_slice %77 {offsets = [0, 0], sizes = [2, 32], strides = [1, 1]} : vector<2x128xf32> to vector<2x32xf32>
    %79 = arith.negf %78 : vector<2x32xf32>
    %80 = math.exp %79 : vector<2x32xf32>
    %cst_26 = arith.constant 1.000000e+00 : f32
    %81 = vector.broadcast %cst_26 : f32 to vector<2x32xf32>
    %82 = arith.addf %81, %80 : vector<2x32xf32>
    %83 = arith.divf %81, %82 : vector<2x32xf32>
    %84 = vector.extract_strided_slice %77 {offsets = [0, 32], sizes = [2, 32], strides = [1, 1]} : vector<2x128xf32> to vector<2x32xf32>
    %85 = arith.negf %84 : vector<2x32xf32>
    %86 = math.exp %85 : vector<2x32xf32>
    %cst_27 = arith.constant 1.000000e+00 : f32
    %87 = vector.broadcast %cst_27 : f32 to vector<2x32xf32>
    %88 = arith.addf %87, %86 : vector<2x32xf32>
    %89 = arith.divf %87, %88 : vector<2x32xf32>
    %90 = vector.extract_strided_slice %77 {offsets = [0, 64], sizes = [2, 32], strides = [1, 1]} : vector<2x128xf32> to vector<2x32xf32>
    %91 = math.tanh %90 : vector<2x32xf32>
    %92 = vector.extract_strided_slice %77 {offsets = [0, 96], sizes = [2, 32], strides = [1, 1]} : vector<2x128xf32> to vector<2x32xf32>
    %93 = arith.negf %92 : vector<2x32xf32>
    %94 = math.exp %93 : vector<2x32xf32>
    %cst_28 = arith.constant 1.000000e+00 : f32
    %95 = vector.broadcast %cst_28 : f32 to vector<2x32xf32>
    %96 = arith.addf %95, %94 : vector<2x32xf32>
    %97 = arith.divf %95, %96 : vector<2x32xf32>
    %98 = arith.mulf %89, %69 : vector<2x32xf32>
    %99 = arith.mulf %83, %91 : vector<2x32xf32>
    %100 = arith.addf %98, %99 : vector<2x32xf32>
    %101 = math.tanh %100 : vector<2x32xf32>
    %102 = arith.mulf %97, %101 : vector<2x32xf32>
    %c3_i32 = arith.constant 3 : i32
    %c2_i32_29 = arith.constant 2 : i32
    %103 = arith.muli %c3_i32, %c2_i32_29 : i32
    %104 = tpu.assume_multiple %103, 2 : i32
    %105 = arith.index_cast %104 : i32 to index
    %c0_30 = arith.constant 0 : index
    %106 = vector.load %arg8[%105, %c0_30] : memref<16x128xf32, #tpu.memory_space<vmem>>, vector<2x128xf32>
    %cst_31 = arith.constant dense<0.000000e+00> : vector<2x128xf32>
    %107 = tpu.matmul %102, %7, %cst_31 {dimension_numbers = #tpu.dot_dimension_numbers<[1], [0], [0], [1], [0, 0, 1, 1], [], []>} : vector<2x32xf32>, vector<32x128xf32>, vector<2x128xf32> -> vector<2x128xf32>
    %108 = arith.addf %106, %107 : vector<2x128xf32>
    %109 = vector.extract_strided_slice %108 {offsets = [0, 0], sizes = [2, 32], strides = [1, 1]} : vector<2x128xf32> to vector<2x32xf32>
    %110 = arith.negf %109 : vector<2x32xf32>
    %111 = math.exp %110 : vector<2x32xf32>
    %cst_32 = arith.constant 1.000000e+00 : f32
    %112 = vector.broadcast %cst_32 : f32 to vector<2x32xf32>
    %113 = arith.addf %112, %111 : vector<2x32xf32>
    %114 = arith.divf %112, %113 : vector<2x32xf32>
    %115 = vector.extract_strided_slice %108 {offsets = [0, 32], sizes = [2, 32], strides = [1, 1]} : vector<2x128xf32> to vector<2x32xf32>
    %116 = arith.negf %115 : vector<2x32xf32>
    %117 = math.exp %116 : vector<2x32xf32>
    %cst_33 = arith.constant 1.000000e+00 : f32
    %118 = vector.broadcast %cst_33 : f32 to vector<2x32xf32>
    %119 = arith.addf %118, %117 : vector<2x32xf32>
    %120 = arith.divf %118, %119 : vector<2x32xf32>
    %121 = vector.extract_strided_slice %108 {offsets = [0, 64], sizes = [2, 32], strides = [1, 1]} : vector<2x128xf32> to vector<2x32xf32>
    %122 = math.tanh %121 : vector<2x32xf32>
    %123 = vector.extract_strided_slice %108 {offsets = [0, 96], sizes = [2, 32], strides = [1, 1]} : vector<2x128xf32> to vector<2x32xf32>
    %124 = arith.negf %123 : vector<2x32xf32>
    %125 = math.exp %124 : vector<2x32xf32>
    %cst_34 = arith.constant 1.000000e+00 : f32
    %126 = vector.broadcast %cst_34 : f32 to vector<2x32xf32>
    %127 = arith.addf %126, %125 : vector<2x32xf32>
    %128 = arith.divf %126, %127 : vector<2x32xf32>
    %129 = arith.mulf %120, %100 : vector<2x32xf32>
    %130 = arith.mulf %114, %122 : vector<2x32xf32>
    %131 = arith.addf %129, %130 : vector<2x32xf32>
    %132 = math.tanh %131 : vector<2x32xf32>
    %133 = arith.mulf %128, %132 : vector<2x32xf32>
    %c4_i32 = arith.constant 4 : i32
    %c2_i32_35 = arith.constant 2 : i32
    %134 = arith.muli %c4_i32, %c2_i32_35 : i32
    %135 = tpu.assume_multiple %134, 2 : i32
    %136 = arith.index_cast %135 : i32 to index
    %c0_36 = arith.constant 0 : index
    %137 = vector.load %arg8[%136, %c0_36] : memref<16x128xf32, #tpu.memory_space<vmem>>, vector<2x128xf32>
    %cst_37 = arith.constant dense<0.000000e+00> : vector<2x128xf32>
    %138 = tpu.matmul %133, %7, %cst_37 {dimension_numbers = #tpu.dot_dimension_numbers<[1], [0], [0], [1], [0, 0, 1, 1], [], []>} : vector<2x32xf32>, vector<32x128xf32>, vector<2x128xf32> -> vector<2x128xf32>
    %139 = arith.addf %137, %138 : vector<2x128xf32>
    %140 = vector.extract_strided_slice %139 {offsets = [0, 0], sizes = [2, 32], strides = [1, 1]} : vector<2x128xf32> to vector<2x32xf32>
    %141 = arith.negf %140 : vector<2x32xf32>
    %142 = math.exp %141 : vector<2x32xf32>
    %cst_38 = arith.constant 1.000000e+00 : f32
    %143 = vector.broadcast %cst_38 : f32 to vector<2x32xf32>
    %144 = arith.addf %143, %142 : vector<2x32xf32>
    %145 = arith.divf %143, %144 : vector<2x32xf32>
    %146 = vector.extract_strided_slice %139 {offsets = [0, 32], sizes = [2, 32], strides = [1, 1]} : vector<2x128xf32> to vector<2x32xf32>
    %147 = arith.negf %146 : vector<2x32xf32>
    %148 = math.exp %147 : vector<2x32xf32>
    %cst_39 = arith.constant 1.000000e+00 : f32
    %149 = vector.broadcast %cst_39 : f32 to vector<2x32xf32>
    %150 = arith.addf %149, %148 : vector<2x32xf32>
    %151 = arith.divf %149, %150 : vector<2x32xf32>
    %152 = vector.extract_strided_slice %139 {offsets = [0, 64], sizes = [2, 32], strides = [1, 1]} : vector<2x128xf32> to vector<2x32xf32>
    %153 = math.tanh %152 : vector<2x32xf32>
    %154 = vector.extract_strided_slice %139 {offsets = [0, 96], sizes = [2, 32], strides = [1, 1]} : vector<2x128xf32> to vector<2x32xf32>
    %155 = arith.negf %154 : vector<2x32xf32>
    %156 = math.exp %155 : vector<2x32xf32>
    %cst_40 = arith.constant 1.000000e+00 : f32
    %157 = vector.broadcast %cst_40 : f32 to vector<2x32xf32>
    %158 = arith.addf %157, %156 : vector<2x32xf32>
    %159 = arith.divf %157, %158 : vector<2x32xf32>
    %160 = arith.mulf %151, %131 : vector<2x32xf32>
    %161 = arith.mulf %145, %153 : vector<2x32xf32>
    %162 = arith.addf %160, %161 : vector<2x32xf32>
    %163 = math.tanh %162 : vector<2x32xf32>
    %164 = arith.mulf %159, %163 : vector<2x32xf32>
    %c5_i32 = arith.constant 5 : i32
    %c2_i32_41 = arith.constant 2 : i32
    %165 = arith.muli %c5_i32, %c2_i32_41 : i32
    %166 = tpu.assume_multiple %165, 2 : i32
    %167 = arith.index_cast %166 : i32 to index
    %c0_42 = arith.constant 0 : index
    %168 = vector.load %arg8[%167, %c0_42] : memref<16x128xf32, #tpu.memory_space<vmem>>, vector<2x128xf32>
    %cst_43 = arith.constant dense<0.000000e+00> : vector<2x128xf32>
    %169 = tpu.matmul %164, %7, %cst_43 {dimension_numbers = #tpu.dot_dimension_numbers<[1], [0], [0], [1], [0, 0, 1, 1], [], []>} : vector<2x32xf32>, vector<32x128xf32>, vector<2x128xf32> -> vector<2x128xf32>
    %170 = arith.addf %168, %169 : vector<2x128xf32>
    %171 = vector.extract_strided_slice %170 {offsets = [0, 0], sizes = [2, 32], strides = [1, 1]} : vector<2x128xf32> to vector<2x32xf32>
    %172 = arith.negf %171 : vector<2x32xf32>
    %173 = math.exp %172 : vector<2x32xf32>
    %cst_44 = arith.constant 1.000000e+00 : f32
    %174 = vector.broadcast %cst_44 : f32 to vector<2x32xf32>
    %175 = arith.addf %174, %173 : vector<2x32xf32>
    %176 = arith.divf %174, %175 : vector<2x32xf32>
    %177 = vector.extract_strided_slice %170 {offsets = [0, 32], sizes = [2, 32], strides = [1, 1]} : vector<2x128xf32> to vector<2x32xf32>
    %178 = arith.negf %177 : vector<2x32xf32>
    %179 = math.exp %178 : vector<2x32xf32>
    %cst_45 = arith.constant 1.000000e+00 : f32
    %180 = vector.broadcast %cst_45 : f32 to vector<2x32xf32>
    %181 = arith.addf %180, %179 : vector<2x32xf32>
    %182 = arith.divf %180, %181 : vector<2x32xf32>
    %183 = vector.extract_strided_slice %170 {offsets = [0, 64], sizes = [2, 32], strides = [1, 1]} : vector<2x128xf32> to vector<2x32xf32>
    %184 = math.tanh %183 : vector<2x32xf32>
    %185 = vector.extract_strided_slice %170 {offsets = [0, 96], sizes = [2, 32], strides = [1, 1]} : vector<2x128xf32> to vector<2x32xf32>
    %186 = arith.negf %185 : vector<2x32xf32>
    %187 = math.exp %186 : vector<2x32xf32>
    %cst_46 = arith.constant 1.000000e+00 : f32
    %188 = vector.broadcast %cst_46 : f32 to vector<2x32xf32>
    %189 = arith.addf %188, %187 : vector<2x32xf32>
    %190 = arith.divf %188, %189 : vector<2x32xf32>
    %191 = arith.mulf %182, %162 : vector<2x32xf32>
    %192 = arith.mulf %176, %184 : vector<2x32xf32>
    %193 = arith.addf %191, %192 : vector<2x32xf32>
    %194 = math.tanh %193 : vector<2x32xf32>
    %195 = arith.mulf %190, %194 : vector<2x32xf32>
    %c6_i32 = arith.constant 6 : i32
    %c2_i32_47 = arith.constant 2 : i32
    %196 = arith.muli %c6_i32, %c2_i32_47 : i32
    %197 = tpu.assume_multiple %196, 2 : i32
    %198 = arith.index_cast %197 : i32 to index
    %c0_48 = arith.constant 0 : index
    %199 = vector.load %arg8[%198, %c0_48] : memref<16x128xf32, #tpu.memory_space<vmem>>, vector<2x128xf32>
    %cst_49 = arith.constant dense<0.000000e+00> : vector<2x128xf32>
    %200 = tpu.matmul %195, %7, %cst_49 {dimension_numbers = #tpu.dot_dimension_numbers<[1], [0], [0], [1], [0, 0, 1, 1], [], []>} : vector<2x32xf32>, vector<32x128xf32>, vector<2x128xf32> -> vector<2x128xf32>
    %201 = arith.addf %199, %200 : vector<2x128xf32>
    %202 = vector.extract_strided_slice %201 {offsets = [0, 0], sizes = [2, 32], strides = [1, 1]} : vector<2x128xf32> to vector<2x32xf32>
    %203 = arith.negf %202 : vector<2x32xf32>
    %204 = math.exp %203 : vector<2x32xf32>
    %cst_50 = arith.constant 1.000000e+00 : f32
    %205 = vector.broadcast %cst_50 : f32 to vector<2x32xf32>
    %206 = arith.addf %205, %204 : vector<2x32xf32>
    %207 = arith.divf %205, %206 : vector<2x32xf32>
    %208 = vector.extract_strided_slice %201 {offsets = [0, 32], sizes = [2, 32], strides = [1, 1]} : vector<2x128xf32> to vector<2x32xf32>
    %209 = arith.negf %208 : vector<2x32xf32>
    %210 = math.exp %209 : vector<2x32xf32>
    %cst_51 = arith.constant 1.000000e+00 : f32
    %211 = vector.broadcast %cst_51 : f32 to vector<2x32xf32>
    %212 = arith.addf %211, %210 : vector<2x32xf32>
    %213 = arith.divf %211, %212 : vector<2x32xf32>
    %214 = vector.extract_strided_slice %201 {offsets = [0, 64], sizes = [2, 32], strides = [1, 1]} : vector<2x128xf32> to vector<2x32xf32>
    %215 = math.tanh %214 : vector<2x32xf32>
    %216 = vector.extract_strided_slice %201 {offsets = [0, 96], sizes = [2, 32], strides = [1, 1]} : vector<2x128xf32> to vector<2x32xf32>
    %217 = arith.negf %216 : vector<2x32xf32>
    %218 = math.exp %217 : vector<2x32xf32>
    %cst_52 = arith.constant 1.000000e+00 : f32
    %219 = vector.broadcast %cst_52 : f32 to vector<2x32xf32>
    %220 = arith.addf %219, %218 : vector<2x32xf32>
    %221 = arith.divf %219, %220 : vector<2x32xf32>
    %222 = arith.mulf %213, %193 : vector<2x32xf32>
    %223 = arith.mulf %207, %215 : vector<2x32xf32>
    %224 = arith.addf %222, %223 : vector<2x32xf32>
    %225 = math.tanh %224 : vector<2x32xf32>
    %226 = arith.mulf %221, %225 : vector<2x32xf32>
    %c7_i32 = arith.constant 7 : i32
    %c2_i32_53 = arith.constant 2 : i32
    %227 = arith.muli %c7_i32, %c2_i32_53 : i32
    %228 = tpu.assume_multiple %227, 2 : i32
    %229 = arith.index_cast %228 : i32 to index
    %c0_54 = arith.constant 0 : index
    %230 = vector.load %arg8[%229, %c0_54] : memref<16x128xf32, #tpu.memory_space<vmem>>, vector<2x128xf32>
    %cst_55 = arith.constant dense<0.000000e+00> : vector<2x128xf32>
    %231 = tpu.matmul %226, %7, %cst_55 {dimension_numbers = #tpu.dot_dimension_numbers<[1], [0], [0], [1], [0, 0, 1, 1], [], []>} : vector<2x32xf32>, vector<32x128xf32>, vector<2x128xf32> -> vector<2x128xf32>
    %232 = arith.addf %230, %231 : vector<2x128xf32>
    %233 = vector.extract_strided_slice %232 {offsets = [0, 0], sizes = [2, 32], strides = [1, 1]} : vector<2x128xf32> to vector<2x32xf32>
    %234 = arith.negf %233 : vector<2x32xf32>
    %235 = math.exp %234 : vector<2x32xf32>
    %cst_56 = arith.constant 1.000000e+00 : f32
    %236 = vector.broadcast %cst_56 : f32 to vector<2x32xf32>
    %237 = arith.addf %236, %235 : vector<2x32xf32>
    %238 = arith.divf %236, %237 : vector<2x32xf32>
    %239 = vector.extract_strided_slice %232 {offsets = [0, 32], sizes = [2, 32], strides = [1, 1]} : vector<2x128xf32> to vector<2x32xf32>
    %240 = arith.negf %239 : vector<2x32xf32>
    %241 = math.exp %240 : vector<2x32xf32>
    %cst_57 = arith.constant 1.000000e+00 : f32
    %242 = vector.broadcast %cst_57 : f32 to vector<2x32xf32>
    %243 = arith.addf %242, %241 : vector<2x32xf32>
    %244 = arith.divf %242, %243 : vector<2x32xf32>
    %245 = vector.extract_strided_slice %232 {offsets = [0, 64], sizes = [2, 32], strides = [1, 1]} : vector<2x128xf32> to vector<2x32xf32>
    %246 = math.tanh %245 : vector<2x32xf32>
    %247 = vector.extract_strided_slice %232 {offsets = [0, 96], sizes = [2, 32], strides = [1, 1]} : vector<2x128xf32> to vector<2x32xf32>
    %248 = arith.negf %247 : vector<2x32xf32>
    %249 = math.exp %248 : vector<2x32xf32>
    %cst_58 = arith.constant 1.000000e+00 : f32
    %250 = vector.broadcast %cst_58 : f32 to vector<2x32xf32>
    %251 = arith.addf %250, %249 : vector<2x32xf32>
    %252 = arith.divf %250, %251 : vector<2x32xf32>
    %253 = arith.mulf %244, %224 : vector<2x32xf32>
    %254 = arith.mulf %238, %246 : vector<2x32xf32>
    %255 = arith.addf %253, %254 : vector<2x32xf32>
    %256 = math.tanh %255 : vector<2x32xf32>
    %257 = arith.mulf %252, %256 : vector<2x32xf32>
    %c8_i32 = arith.constant 8 : i32
    %c0_59 = arith.constant 0 : index
    %c0_60 = arith.constant 0 : index
    %258 = vector.load %arg5[%c0_59, %c0_60] : memref<32x4xf32, #tpu.memory_space<vmem>>, vector<32x4xf32>
    %cst_61 = arith.constant dense<0.000000e+00> : vector<2x4xf32>
    %259 = tpu.matmul %257, %258, %cst_61 {dimension_numbers = #tpu.dot_dimension_numbers<[1], [0], [0], [1], [0, 0, 1, 1], [], []>} : vector<2x32xf32>, vector<32x4xf32>, vector<2x4xf32> -> vector<2x4xf32>
    %c0_62 = arith.constant 0 : index
    %c0_63 = arith.constant 0 : index
    %260 = vector.load %arg6[%c0_62, %c0_63] : memref<1x4xf32, #tpu.memory_space<vmem>>, vector<1x4xf32>
    %261 = vector.broadcast %260 : vector<1x4xf32> to vector<2x4xf32>
    %262 = arith.addf %259, %261 : vector<2x4xf32>
    %c0_64 = arith.constant 0 : index
    %c0_65 = arith.constant 0 : index
    %263 = vector.load %arg7[%c0_64, %c0_65] : memref<2x4xf32, #tpu.memory_space<vmem>>, vector<2x4xf32>
    tpu.vector_store %arg7[%c0_64, %c0_65], %262 {strides = array<i32>} : memref<2x4xf32, #tpu.memory_space<vmem>>, vector<2x4xf32>,
    return
  }
  func.func @transform_0(%arg0: i32) -> (i32, i32) {
    %c0_i32 = arith.constant 0 : i32
    %c0_i32_0 = arith.constant 0 : i32
    %c0_i32_1 = arith.constant 0 : i32
    return %c0_i32, %c0_i32_0 : i32, i32
  }
  func.func @transform_1(%arg0: i32) -> (i32, i32) {
    %c0_i32 = arith.constant 0 : i32
    %c0_i32_0 = arith.constant 0 : i32
    %c0_i32_1 = arith.constant 0 : i32
    return %c0_i32, %c0_i32_0 : i32, i32
  }
  func.func @transform_2(%arg0: i32) -> (i32, i32) {
    %c0_i32 = arith.constant 0 : i32
    %c0_i32_0 = arith.constant 0 : i32
    %c0_i32_1 = arith.constant 0 : i32
    return %c0_i32, %c0_i32_0 : i32, i32
  }
  func.func @transform_3(%arg0: i32) -> (i32, i32) {
    %c0_i32 = arith.constant 0 : i32
    %c0_i32_0 = arith.constant 0 : i32
    %c0_i32_1 = arith.constant 0 : i32
    return %c0_i32, %c0_i32_0 : i32, i32
  }
  func.func @transform_4(%arg0: i32) -> (i32, i32) {
    %c0_i32 = arith.constant 0 : i32
    %c0_i32_0 = arith.constant 0 : i32
    %c0_i32_1 = arith.constant 0 : i32
    return %c0_i32, %c0_i32_0 : i32, i32
  }
  func.func @transform_5(%arg0: i32) -> (i32, i32) {
    %c0_i32 = arith.constant 0 : i32
    %c0_i32_0 = arith.constant 0 : i32
    %c0_i32_1 = arith.constant 0 : i32
    return %c0_i32, %c0_i32_0 : i32, i32
  }
  func.func @transform_6(%arg0: i32) -> (i32, i32) {
    %c0_i32 = arith.constant 0 : i32
    %c0_i32_0 = arith.constant 0 : i32
    %c0_i32_1 = arith.constant 0 : i32
    return %c0_i32, %c0_i32_0 : i32, i32
  }
}

</mosaic_0001>

<bundles_post_ra>
// kernel: tpu_custom_call.1
= control target key start
LH: loop header
LB: loop body
LE: loop exit
PB: predicated region body
PF: predicated region fallthrough
CT: control target
= control target key end

     0   :  { %11 = vsyncpa [#allocation4], 0  ;;  %s969_s0 = inlined_call_operand.hbm [shape: f32[16,16], index: 0, kind: input, shape index: {}]   ;;  %s970_s1 = inlined_call_operand.hbm [shape: f32[16,128], index: 1, kind: input, shape index: {}]   ;;  %s971_s2 = inlined_call_operand.vmem [shape: f32[32,128], index: 2, kind: input, shape index: {}]   ;;  %s972_s3 = inlined_call_operand.vmem [shape: f32[1,128], index: 3, kind: input, shape index: {}]   ;;  %s973_s4 = inlined_call_operand.vmem [shape: f32[32,4], index: 4, kind: input, shape index: {}]   ;;  %s974_s5 = inlined_call_operand.vmem [shape: f32[1,4], index: 5, kind: input, shape index: {}]   ;;  %s975_s6 = inlined_call_operand.hbm [shape: f32[2,4], index: 6, kind: output, shape index: {}]  }
   0x1   :  { %12 = vsyncpa [#allocation7], 0 }
   0x2   :  { %13 = vsyncpa [#allocation5], 0  ;;  %s18_s23 = sshll.u32 %s969_s0, 4  ;;  %s841_s24 = smov [#allocation3]   ;;  %s19_s23 = int_to_ptr.hbm [resolvable:$true] %s18_s23 }
   0x3   :  { %s20_s25 = sshll.u32 %s841_s24, 4  ;;  %s31_s28 = sshll.u32 %s970_s1, 4  ;;  %s21_s25 = int_to_ptr.vmem [resolvable:$true] %s20_s25  ;;  %s32_s28 = int_to_ptr.hbm [resolvable:$true] %s31_s28 }
   0x4   :  { %s842_s29 = smov 128   ;;  %s843_s30 = smov 8  }
   0x5   :  { %26 = dma.hbm_to_vmem [thread:$0]  %s19_s23, 256, %s21_s25, [#allocation4], %s842_s29, %s842_s29, %s843_s30  }
   0x6   :  { %s844_s7 = smov [#allocation6]  }
   0x7   :  { %s33_s8 = sshll.u32 %s844_s7, 4  ;;  %s34_s8 = int_to_ptr.vmem [resolvable:$true] %s33_s8 }
   0x8   :  { %39 = dma.hbm_to_vmem [thread:$0]  %s32_s28, 256, %s34_s8, [#allocation7], %s842_s29, %s842_s29, %s843_s30  }
   0x9   :  { %835 = dma.done.wait [#allocation4], 256  }
   0xa   :  { %836 = vsyncadd [#allocation4], 4294967040 }
   0xb   :  { %837 = dma.done.wait [#allocation7], 256  }
   0xc   :  { %838 = vsyncadd [#allocation7], 4294967040  ;;  %v59_v0 = vld [vmem:[#allocation6 + $0x8] sm:$0xff]  ;;  %v58_v1 = vld [vmem:[#allocation6] sm:$0xff]  ;;  %vm64_vm0 = vcmask 130048   ;;  %v845_v7 = vmov 0.0  }
   0xd   :  { %85 = vmatpush.msra.mxu0 %v59_v0  ;;  %v56_v2 = vld [vmem:[#allocation3] sm:$0xff]  ;;  %v99_v3 = vld [vmem:[%s971_s2 + $0x18] sm:$0xff]  ;;  %v97_v5 = vld [vmem:[%s971_s2 + $0x8] sm:$0xff]  ;;  %s846_s16 = smov 64   ;;  %vm101_vm5 = vcmask 261120   ;;  %s848_s27 = smov [#allocation8]  }
   0xe   :  { %v98_v4 = vld [vmem:[%s971_s2 + $0x10] sm:$0xff]  ;;  %117 = vmatpush.msra.mxu1 %v99_v3  ;;  %182 = vmatpush.msra.mxu2 %v99_v3  ;;  %v96_v6 = vld [vmem:[%s971_s2] sm:$0xff]  ;;  %s658_s28 = sshll.u32 %s848_s27, 4  ;;  %s660_s7 = sshll.u32 %s975_s6, 4  ;;  %s659_s28 = int_to_ptr.vmem [resolvable:$true] %s658_s28  ;;  %s661_s7 = int_to_ptr.hbm [resolvable:$true] %s660_s7 }
   0xf   :  { %86 = vmatpush.msra.mxu0 %v58_v1  ;;  %247 = vmatpush.msra.mxu3 %v99_v3  ;;  %v906_v8 = vld [vmem:[%s972_s3] ss:$0 sm:$0xff]  ;;  %s847_s3 = smov 32  }
  0x10   :  { %671 = vmatmul.msk.f32.vlgmr.msra.gmra.mxu0 %vm64_vm0, %v56_v2  ;;  %118 = vmatpush.msra.mxu1 %v98_v4 }
  0x11   :  { %183 = vmatpush.msra.mxu2 %v98_v4  ;;  %248 = vmatpush.msra.mxu3 %v98_v4 }
  0x12   :  { %119 = vmatpush.msra.mxu1 %v97_v5  ;;  %507 = vmatpush.msrb.mxu0 %v99_v3 }
  0x13   :  { %184 = vmatpush.msra.mxu2 %v97_v5  ;;  %249 = vmatpush.msra.mxu3 %v97_v5 }
  0x14   :  { %120 = vmatpush.msra.mxu1 %v96_v6  ;;  %508 = vmatpush.msrb.mxu0 %v98_v4 }
  0x15   :  { %121 = vmatmul.f32.vlgmr.msra.gmra.mxu1 %v845_v7  ;;  %185 = vmatpush.msra.mxu2 %v96_v6 }
  0x16   :  { %250 = vmatpush.msra.mxu3 %v96_v6  ;;  %312 = vmatpush.msrb.mxu1 %v99_v3 }
  0x17   :  { %377 = vmatpush.msrb.mxu2 %v99_v3  ;;  %509 = vmatpush.msrb.mxu0 %v97_v5 }
  0x18   :  { %442 = vmatpush.msrb.mxu3 %v99_v3  ;;  %313 = vmatpush.msrb.mxu1 %v98_v4 }
  0x19   :  { %378 = vmatpush.msrb.mxu2 %v98_v4  ;;  %510 = vmatpush.msrb.mxu0 %v96_v6 }
  0x1a   :  { %443 = vmatpush.msrb.mxu3 %v98_v4  ;;  %314 = vmatpush.msrb.mxu1 %v97_v5 }
  0x1b   :  { %379 = vmatpush.msrb.mxu2 %v97_v5 }
  0x1c   :  { %444 = vmatpush.msrb.mxu3 %v97_v5  ;;  %315 = vmatpush.msrb.mxu1 %v96_v6 }
  0x1d   :  { %380 = vmatpush.msrb.mxu2 %v96_v6 }
  0x1e   :  { %445 = vmatpush.msrb.mxu3 %v96_v6  ;;  %572 = vmatpush.msra.mxu1 %v99_v3 }
  0x20   :  { %573 = vmatpush.msra.mxu1 %v98_v4 }
  0x22   :  { %574 = vmatpush.msra.mxu1 %v97_v5 }
  0x24   :  { %575 = vmatpush.msra.mxu1 %v96_v6 }
  0x8d   :  { %v88_v9 = vpop.f32.mrf.mxu0 }
  0x8e   :  { %v89_v10 = vadd.f32 %v906_v8, %v88_v9 }
  0x90   :  { %94 = vst [vmem:[#allocation2] sm:$0xff] %v89_v10 }
  0x92   :  { %v122_v11 = vpop.f32.mrf.mxu1 }
  0x97   :  { %v100_v12 = vld [vmem:[#allocation2] sm:$0x3]  ;;  %v164_v37 = vld [vmem:[#allocation2 + $0x2] sm:$0x3]  ;;  %v229_v63 = vld [vmem:[#allocation2 + $0x4] sm:$0x3] }
  0x98   :  { %v125_v13 = vadd.f32 %v122_v11, %v100_v12 }
  0x9a   :  { %699 = vtanh.f32 %v125_v13  ;;  %v673_v15 = vmul.f32 -1.442695, %v125_v13 }
  0x9c   :  { %701 = vpow2.f32 %v673_v15 }
  0xa0   :  { %v700_v14 = vpop.eup %699 }
  0xa1   :  { %148 = vrot.lane.b32.xlu0 %v700_v14, %s846_s16 }
  0xa2   :  { %v702_v16 = vpop.eup %701 }
  0xa3   :  { %v129_v17 = vadd.f32 1.0, %v702_v16 }
  0xa5   :  { %703 = vrcp.f32 %v129_v17  ;;  %v141_v23 = vand.u32 2147483648, %v129_v17  ;;  %vm135_vm2 = vweird.f32 %v129_v17  ;;  %v139_v24 = vand.u32 2147483647, %v129_v17 }
  0xa7   :  { %v142_v26 = vor.u32 1.1754944e-38, %v141_v23  ;;  %vm140_vm4 = vcmp.eq.f32.partialorder %v139_v24, 8.507059e+37 }
  0xab   :  { %v704_v18 = vpop.eup %703 }
  0xac   :  { %v131_v19 = vmul.f32 %v704_v18, %v129_v17  ;;  %vm136_vm1 = vweird.f32 %v704_v18 }
  0xad   :  { %vm137_vm3 = vmor %vm135_vm2, %vm136_vm1 }
  0xae   :  { %v132_v20 = vsub.f32 1.0, %v131_v19 }
  0xb0   :  { %v133_v21 = vmul.f32 %v704_v18, %v132_v20 }
  0xb2   :  { %v134_v22 = vadd.f32 %v704_v18, %v133_v21 }
  0xb4   :  { %v138_v25 = vsel %vm137_vm3, %v704_v18, %v134_v22 }
  0xb5   :  { %v143_v28 = vsel %vm140_vm4, %v142_v26, %v138_v25  ;;  %v294_v26 = vld [vmem:[#allocation2 + $0x6] sm:$0x3] }
  0xb6   :  { %v146_v30 = vmul.f32 0.0, %v143_v28 }
 0x113   :  { %v149_v27 = vpop.permute.xlu0 %148 }
 0x114   :  { %v151_v29 = vmul.f32 %v149_v27, %v143_v28 }
 0x116   :  { %153 = vrot.lane.b32.xlu0 %v151_v29, %s847_s3 }
 0x188   :  { %v154_v31 = vpop.permute.xlu0 %153 }
 0x189   :  { %v156_v32 = vadd.f32 %v154_v31, %v146_v30 }
 0x18b   :  { %705 = vtanh.f32 %v156_v32 }
 0x191   :  { %v706_v33 = vpop.eup %705 }
 0x192   :  { %159 = vrot.lane.b32.xlu1 %v706_v33, %s846_s16 }
 0x204   :  { %v160_v34 = vpop.permute.xlu1 %159 }
 0x205   :  { %v162_v35 = vmul.f32 %v160_v34, %v143_v28 }
 0x207   :  { %166 = vrot.lane.b32.xlu1 %v162_v35, %s847_s3 }
 0x279   :  { %v167_v36 = vpop.permute.xlu1 %166 }
 0x27a   :  { %674 = vmatmul.msk.f32.vlgmr.msra.gmra.mxu2 %vm101_vm5, %v167_v36 }
 0x2fd   :  { %v187_v38 = vpop.f32.mrf.mxu2 }
 0x2fe   :  { %v190_v39 = vadd.f32 %v187_v38, %v164_v37 }
 0x300   :  { %707 = vtanh.f32 %v190_v39  ;;  %v675_v41 = vmul.f32 -1.442695, %v190_v39 }
 0x302   :  { %709 = vpow2.f32 %v675_v41 }
 0x306   :  { %v708_v40 = vpop.eup %707 }
 0x307   :  { %213 = vrot.lane.b32.xlu2 %v708_v40, %s846_s16 }
 0x308   :  { %v710_v42 = vpop.eup %709 }
 0x309   :  { %v194_v43 = vadd.f32 1.0, %v710_v42 }
 0x30b   :  { %711 = vrcp.f32 %v194_v43  ;;  %v206_v49 = vand.u32 2147483648, %v194_v43  ;;  %vm200_vm7 = vweird.f32 %v194_v43  ;;  %v204_v50 = vand.u32 2147483647, %v194_v43 }
 0x30d   :  { %v207_v52 = vor.u32 1.1754944e-38, %v206_v49  ;;  %vm205_vm9 = vcmp.eq.f32.partialorder %v204_v50, 8.507059e+37  ;;  %v57_v49 = vld [vmem:[#allocation3 + $0x8] sm:$0xff] }
 0x30e   :  { %672 = vmatmul.msk.f32.gmra.mxu0 %vm64_vm0, %v57_v49 }
 0x311   :  { %v712_v44 = vpop.eup %711 }
 0x312   :  { %v196_v45 = vmul.f32 %v712_v44, %v194_v43  ;;  %vm201_vm6 = vweird.f32 %v712_v44 }
 0x313   :  { %vm202_vm8 = vmor %vm200_vm7, %vm201_vm6 }
 0x314   :  { %v197_v46 = vsub.f32 1.0, %v196_v45 }
 0x316   :  { %v198_v47 = vmul.f32 %v712_v44, %v197_v46 }
 0x318   :  { %v199_v48 = vadd.f32 %v712_v44, %v198_v47 }
 0x31a   :  { %v203_v51 = vsel %vm202_vm8, %v712_v44, %v199_v48 }
 0x31b   :  { %v208_v54 = vsel %vm205_vm9, %v207_v52, %v203_v51 }
 0x31c   :  { %v211_v56 = vmul.f32 %v208_v54, %v156_v32 }
 0x361   :  { %v214_v53 = vpop.permute.xlu2 %213 }
 0x362   :  { %v216_v55 = vmul.f32 %v214_v53, %v208_v54 }
 0x364   :  { %218 = vrot.lane.b32.xlu2 %v216_v55, %s847_s3 }
 0x38b   :  { %v91_v52 = vpop.f32.mrf.mxu0 }
 0x38c   :  { %v92_v53 = vadd.f32 %v906_v8, %v91_v52 }
 0x38e   :  { %95 = vst [vmem:[#allocation2 + $0x8] sm:$0xff] %v92_v53 }
 0x395   :  { %v359_v55 = vld [vmem:[#allocation2 + $0x8] sm:$0x3] }
 0x3be   :  { %v219_v57 = vpop.permute.xlu2 %218 }
 0x3bf   :  { %v221_v58 = vadd.f32 %v219_v57, %v211_v56 }
 0x3c1   :  { %713 = vtanh.f32 %v221_v58 }
 0x3c7   :  { %v714_v59 = vpop.eup %713 }
 0x3c8   :  { %224 = vrot.lane.b32.xlu0 %v714_v59, %s846_s16 }
 0x43a   :  { %v225_v60 = vpop.permute.xlu0 %224 }
 0x43b   :  { %v227_v61 = vmul.f32 %v225_v60, %v208_v54 }
 0x43d   :  { %231 = vrot.lane.b32.xlu1 %v227_v61, %s847_s3 }
 0x4af   :  { %v232_v62 = vpop.permute.xlu1 %231 }
 0x4b0   :  { %676 = vmatmul.msk.f32.vlgmr.msra.gmra.mxu3 %vm101_vm5, %v232_v62 }
 0x533   :  { %v252_v0 = vpop.f32.mrf.mxu3 }
 0x534   :  { %v255_v1 = vadd.f32 %v252_v0, %v229_v63 }
 0x536   :  { %715 = vtanh.f32 %v255_v1  ;;  %v677_v3 = vmul.f32 -1.442695, %v255_v1 }
 0x538   :  { %717 = vpow2.f32 %v677_v3 }
 0x53c   :  { %v716_v2 = vpop.eup %715 }
 0x53d   :  { %278 = vrot.lane.b32.xlu2 %v716_v2, %s846_s16 }
 0x53e   :  { %v718_v4 = vpop.eup %717 }
 0x53f   :  { %v259_v5 = vadd.f32 1.0, %v718_v4 }
 0x541   :  { %719 = vrcp.f32 %v259_v5  ;;  %v271_v12 = vand.u32 2147483648, %v259_v5  ;;  %vm265_vm11 = vweird.f32 %v259_v5  ;;  %v269_v13 = vand.u32 2147483647, %v259_v5 }
 0x543   :  { %v272_v15 = vor.u32 1.1754944e-38, %v271_v12  ;;  %vm270_vm13 = vcmp.eq.f32.partialorder %v269_v13, 8.507059e+37 }
 0x547   :  { %v720_v6 = vpop.eup %719 }
 0x548   :  { %v261_v7 = vmul.f32 %v720_v6, %v259_v5  ;;  %vm266_vm10 = vweird.f32 %v720_v6 }
 0x549   :  { %vm267_vm12 = vmor %vm265_vm11, %vm266_vm10 }
 0x54a   :  { %v262_v9 = vsub.f32 1.0, %v261_v7 }
 0x54c   :  { %v263_v10 = vmul.f32 %v720_v6, %v262_v9 }
 0x54e   :  { %v264_v11 = vadd.f32 %v720_v6, %v263_v10 }
 0x550   :  { %v268_v14 = vsel %vm267_vm12, %v720_v6, %v264_v11 }
 0x551   :  { %v273_v17 = vsel %vm270_vm13, %v272_v15, %v268_v14 }
 0x552   :  { %v276_v19 = vmul.f32 %v273_v17, %v221_v58 }
 0x597   :  { %v279_v16 = vpop.permute.xlu2 %278 }
 0x598   :  { %v281_v18 = vmul.f32 %v279_v16, %v273_v17 }
 0x59a   :  { %283 = vrot.lane.b32.xlu0 %v281_v18, %s847_s3 }
 0x60c   :  { %v284_v20 = vpop.permute.xlu0 %283 }
 0x60d   :  { %v286_v21 = vadd.f32 %v284_v20, %v276_v19 }
 0x60f   :  { %721 = vtanh.f32 %v286_v21 }
 0x615   :  { %v722_v22 = vpop.eup %721 }
 0x616   :  { %289 = vrot.lane.b32.xlu1 %v722_v22, %s846_s16 }
 0x688   :  { %v290_v23 = vpop.permute.xlu1 %289 }
 0x689   :  { %v292_v24 = vmul.f32 %v290_v23, %v273_v17  ;;  %v424_v17 = vld [vmem:[#allocation2 + $0xa] sm:$0x3] }
 0x68b   :  { %296 = vrot.lane.b32.xlu2 %v292_v24, %s847_s3 }
 0x6e5   :  { %v297_v25 = vpop.permute.xlu2 %296 }
 0x6e6   :  { %678 = vmatmul.msk.f32.vlgmr.msrb.gmra.mxu1 %vm101_vm5, %v297_v25 }
 0x763   :  { %v317_v27 = vpop.f32.mrf.mxu1 }
 0x764   :  { %v320_v28 = vadd.f32 %v317_v27, %v294_v26 }
 0x766   :  { %723 = vtanh.f32 %v320_v28  ;;  %v679_v30 = vmul.f32 -1.442695, %v320_v28 }
 0x768   :  { %725 = vpow2.f32 %v679_v30 }
 0x76c   :  { %v724_v29 = vpop.eup %723 }
 0x76d   :  { %343 = vrot.lane.b32.xlu0 %v724_v29, %s846_s16 }
 0x76e   :  { %v726_v31 = vpop.eup %725 }
 0x76f   :  { %v324_v32 = vadd.f32 1.0, %v726_v31 }
 0x771   :  { %727 = vrcp.f32 %v324_v32  ;;  %v336_v38 = vand.u32 2147483648, %v324_v32  ;;  %vm330_vm15 = vweird.f32 %v324_v32  ;;  %v334_v39 = vand.u32 2147483647, %v324_v32 }
 0x773   :  { %v337_v41 = vor.u32 1.1754944e-38, %v336_v38  ;;  %vm335_vm2 = vcmp.eq.f32.partialorder %v334_v39, 8.507059e+37 }
 0x777   :  { %v728_v33 = vpop.eup %727 }
 0x778   :  { %v326_v34 = vmul.f32 %v728_v33, %v324_v32  ;;  %vm331_vm14 = vweird.f32 %v728_v33 }
 0x779   :  { %vm332_vm1 = vmor %vm330_vm15, %vm331_vm14 }
 0x77a   :  { %v327_v35 = vsub.f32 1.0, %v326_v34 }
 0x77c   :  { %v328_v36 = vmul.f32 %v728_v33, %v327_v35 }
 0x77e   :  { %v329_v37 = vadd.f32 %v728_v33, %v328_v36 }
 0x780   :  { %v333_v40 = vsel %vm332_vm1, %v728_v33, %v329_v37 }
 0x781   :  { %v338_v43 = vsel %vm335_vm2, %v337_v41, %v333_v40 }
 0x782   :  { %v341_v45 = vmul.f32 %v338_v43, %v286_v21 }
 0x7df   :  { %v344_v42 = vpop.permute.xlu0 %343 }
 0x7e0   :  { %v346_v44 = vmul.f32 %v344_v42, %v338_v43 }
 0x7e2   :  { %348 = vrot.lane.b32.xlu1 %v346_v44, %s847_s3 }
 0x854   :  { %v349_v46 = vpop.permute.xlu1 %348 }
 0x855   :  { %v351_v47 = vadd.f32 %v349_v46, %v341_v45 }
 0x857   :  { %729 = vtanh.f32 %v351_v47 }
 0x85d   :  { %v730_v48 = vpop.eup %729 }
 0x85e   :  { %354 = vrot.lane.b32.xlu2 %v730_v48, %s846_s16 }
 0x8b8   :  { %v355_v50 = vpop.permute.xlu2 %354 }
 0x8b9   :  { %v357_v51 = vmul.f32 %v355_v50, %v338_v43  ;;  %v489_v43 = vld [vmem:[#allocation2 + $0xc] sm:$0x3] }
 0x8bb   :  { %361 = vrot.lane.b32.xlu0 %v357_v51, %s847_s3 }
 0x92d   :  { %v362_v54 = vpop.permute.xlu0 %361 }
 0x92e   :  { %680 = vmatmul.msk.f32.vlgmr.msrb.gmra.mxu2 %vm101_vm5, %v362_v54 }
 0x9b1   :  { %v382_v56 = vpop.f32.mrf.mxu2 }
 0x9b2   :  { %v385_v57 = vadd.f32 %v382_v56, %v359_v55 }
 0x9b4   :  { %731 = vtanh.f32 %v385_v57  ;;  %v681_v59 = vmul.f32 -1.442695, %v385_v57 }
 0x9b6   :  { %733 = vpow2.f32 %v681_v59 }
 0x9ba   :  { %v732_v58 = vpop.eup %731 }
 0x9bb   :  { %408 = vrot.lane.b32.xlu1 %v732_v58, %s846_s16 }
 0x9bc   :  { %v734_v60 = vpop.eup %733 }
 0x9bd   :  { %v389_v61 = vadd.f32 1.0, %v734_v60 }
 0x9bf   :  { %735 = vrcp.f32 %v389_v61  ;;  %v401_v2 = vand.u32 2147483648, %v389_v61  ;;  %vm395_vm3 = vweird.f32 %v389_v61  ;;  %v399_v3 = vand.u32 2147483647, %v389_v61 }
 0x9c1   :  { %v402_v5 = vor.u32 1.1754944e-38, %v401_v2  ;;  %vm400_vm6 = vcmp.eq.f32.partialorder %v399_v3, 8.507059e+37 }
 0x9c5   :  { %v736_v62 = vpop.eup %735 }
 0x9c6   :  { %v391_v63 = vmul.f32 %v736_v62, %v389_v61  ;;  %vm396_vm0 = vweird.f32 %v736_v62 }
 0x9c7   :  { %vm397_vm4 = vmor %vm395_vm3, %vm396_vm0  ;;  %vm651_vm3 = vcmask 25600  }
 0x9c8   :  { %v392_v0 = vsub.f32 1.0, %v391_v63 }
 0x9ca   :  { %v393_v8 = vmul.f32 %v736_v62, %v392_v0 }
 0x9cc   :  { %v394_v1 = vadd.f32 %v736_v62, %v393_v8 }
 0x9ce   :  { %v398_v4 = vsel %vm397_vm4, %v736_v62, %v394_v1 }
 0x9cf   :  { %v403_v7 = vsel %vm400_vm6, %v402_v5, %v398_v4  ;;  %v554_v4 = vld [vmem:[#allocation2 + $0xe] sm:$0x3] }
 0x9d0   :  { %v406_v10 = vmul.f32 %v403_v7, %v351_v47 }
 0xa2d   :  { %v409_v6 = vpop.permute.xlu1 %408 }
 0xa2e   :  { %v411_v9 = vmul.f32 %v409_v6, %v403_v7 }
 0xa30   :  { %413 = vrot.lane.b32.xlu2 %v411_v9, %s847_s3 }
 0xa8a   :  { %v414_v11 = vpop.permute.xlu2 %413 }
 0xa8b   :  { %v416_v12 = vadd.f32 %v414_v11, %v406_v10 }
 0xa8d   :  { %737 = vtanh.f32 %v416_v12 }
 0xa93   :  { %v738_v13 = vpop.eup %737 }
 0xa94   :  { %419 = vrot.lane.b32.xlu0 %v738_v13, %s846_s16 }
 0xb06   :  { %v420_v14 = vpop.permute.xlu0 %419 }
 0xb07   :  { %v422_v15 = vmul.f32 %v420_v14, %v403_v7 }
 0xb09   :  { %426 = vrot.lane.b32.xlu1 %v422_v15, %s847_s3 }
 0xb7b   :  { %v427_v16 = vpop.permute.xlu1 %426 }
 0xb7c   :  { %682 = vmatmul.msk.f32.vlgmr.msrb.gmra.mxu3 %vm101_vm5, %v427_v16 }
 0xbff   :  { %v447_v18 = vpop.f32.mrf.mxu3 }
 0xc00   :  { %v450_v19 = vadd.f32 %v447_v18, %v424_v17 }
 0xc02   :  { %739 = vtanh.f32 %v450_v19  ;;  %v683_v21 = vmul.f32 -1.442695, %v450_v19 }
 0xc04   :  { %741 = vpow2.f32 %v683_v21 }
 0xc08   :  { %v740_v20 = vpop.eup %739 }
 0xc09   :  { %473 = vrot.lane.b32.xlu2 %v740_v20, %s846_s16 }
 0xc0a   :  { %v742_v22 = vpop.eup %741 }
 0xc0b   :  { %v454_v23 = vadd.f32 1.0, %v742_v22 }
 0xc0d   :  { %743 = vrcp.f32 %v454_v23  ;;  %v466_v29 = vand.u32 2147483648, %v454_v23  ;;  %vm460_vm8 = vweird.f32 %v454_v23  ;;  %v464_v30 = vand.u32 2147483647, %v454_v23 }
 0xc0f   :  { %v467_v32 = vor.u32 1.1754944e-38, %v466_v29  ;;  %vm465_vm10 = vcmp.eq.f32.partialorder %v464_v30, 8.507059e+37  ;;  %v620_v29 = vld [vmem:[%s973_s4 + $0x10] sm:$0xff]  ;;  %v619_v30 = vld [vmem:[%s973_s4 + $0x8] sm:$0xff] }
 0xc13   :  { %v744_v24 = vpop.eup %743 }
 0xc14   :  { %v456_v25 = vmul.f32 %v744_v24, %v454_v23  ;;  %vm461_vm7 = vweird.f32 %v744_v24 }
 0xc15   :  { %vm462_vm9 = vmor %vm460_vm8, %vm461_vm7 }
 0xc16   :  { %v457_v26 = vsub.f32 1.0, %v456_v25 }
 0xc18   :  { %v458_v27 = vmul.f32 %v744_v24, %v457_v26 }
 0xc1a   :  { %v459_v28 = vadd.f32 %v744_v24, %v458_v27 }
 0xc1c   :  { %v463_v31 = vsel %vm462_vm9, %v744_v24, %v459_v28  ;;  %v621_v28 = vld [vmem:[%s973_s4 + $0x18] sm:$0xff] }
 0xc1d   :  { %v468_v34 = vsel %vm465_vm10, %v467_v32, %v463_v31  ;;  %643 = vmatpush.msra.mxu2 %v621_v28  ;;  %v618_v31 = vld [vmem:[%s973_s4] sm:$0xff] }
 0xc1e   :  { %v471_v36 = vmul.f32 %v468_v34, %v416_v12 }
 0xc1f   :  { %644 = vmatpush.msra.mxu2 %v620_v29 }
 0xc21   :  { %645 = vmatpush.msra.mxu2 %v619_v30 }
 0xc23   :  { %646 = vmatpush.msra.mxu2 %v618_v31 }
 0xc63   :  { %v474_v33 = vpop.permute.xlu2 %473 }
 0xc64   :  { %v476_v35 = vmul.f32 %v474_v33, %v468_v34 }
 0xc66   :  { %478 = vrot.lane.b32.xlu0 %v476_v35, %s847_s3  ;;  %v698_v35 = vld [vmem:[%s974_s5] ss:$0 sm:$0xff] }
 0xcd8   :  { %v479_v37 = vpop.permute.xlu0 %478 }
 0xcd9   :  { %v481_v38 = vadd.f32 %v479_v37, %v471_v36 }
 0xcdb   :  { %745 = vtanh.f32 %v481_v38 }
 0xce1   :  { %v746_v39 = vpop.eup %745 }
 0xce2   :  { %484 = vrot.lane.b32.xlu1 %v746_v39, %s846_s16 }
 0xd54   :  { %v485_v40 = vpop.permute.xlu1 %484 }
 0xd55   :  { %v487_v41 = vmul.f32 %v485_v40, %v468_v34 }
 0xd57   :  { %491 = vrot.lane.b32.xlu2 %v487_v41, %s847_s3 }
 0xdb1   :  { %v492_v42 = vpop.permute.xlu2 %491 }
 0xdb2   :  { %684 = vmatmul.msk.f32.vlgmr.msrb.gmra.mxu0 %vm101_vm5, %v492_v42 }
 0xe2f   :  { %v512_v44 = vpop.f32.mrf.mxu0 }
 0xe30   :  { %v515_v45 = vadd.f32 %v512_v44, %v489_v43 }
 0xe32   :  { %747 = vtanh.f32 %v515_v45  ;;  %v685_v47 = vmul.f32 -1.442695, %v515_v45 }
 0xe34   :  { %749 = vpow2.f32 %v685_v47 }
 0xe38   :  { %v748_v46 = vpop.eup %747 }
 0xe39   :  { %538 = vrot.lane.b32.xlu0 %v748_v46, %s846_s16 }
 0xe3a   :  { %v750_v48 = vpop.eup %749 }
 0xe3b   :  { %v519_v49 = vadd.f32 1.0, %v750_v48 }
 0xe3d   :  { %751 = vrcp.f32 %v519_v49  ;;  %v531_v55 = vand.u32 2147483648, %v519_v49  ;;  %vm525_vm12 = vweird.f32 %v519_v49  ;;  %v529_v56 = vand.u32 2147483647, %v519_v49 }
 0xe3f   :  { %v532_v58 = vor.u32 1.1754944e-38, %v531_v55  ;;  %vm530_vm14 = vcmp.eq.f32.partialorder %v529_v56, 8.507059e+37 }
 0xe43   :  { %v752_v50 = vpop.eup %751 }
 0xe44   :  { %v521_v51 = vmul.f32 %v752_v50, %v519_v49  ;;  %vm526_vm11 = vweird.f32 %v752_v50 }
 0xe45   :  { %vm527_vm13 = vmor %vm525_vm12, %vm526_vm11 }
 0xe46   :  { %v522_v52 = vsub.f32 1.0, %v521_v51 }
 0xe48   :  { %v523_v53 = vmul.f32 %v752_v50, %v522_v52 }
 0xe4a   :  { %v524_v54 = vadd.f32 %v752_v50, %v523_v53 }
 0xe4c   :  { %v528_v57 = vsel %vm527_vm13, %v752_v50, %v524_v54 }
 0xe4d   :  { %v533_v60 = vsel %vm530_vm14, %v532_v58, %v528_v57 }
 0xe4e   :  { %v536_v62 = vmul.f32 %v533_v60, %v481_v38 }
 0xeab   :  { %v539_v59 = vpop.permute.xlu0 %538 }
 0xeac   :  { %v541_v61 = vmul.f32 %v539_v59, %v533_v60 }
 0xeae   :  { %543 = vrot.lane.b32.xlu1 %v541_v61, %s847_s3 }
 0xf20   :  { %v544_v63 = vpop.permute.xlu1 %543 }
 0xf21   :  { %v546_v0 = vadd.f32 %v544_v63, %v536_v62 }
 0xf23   :  { %753 = vtanh.f32 %v546_v0 }
 0xf29   :  { %v754_v8 = vpop.eup %753 }
 0xf2a   :  { %549 = vrot.lane.b32.xlu2 %v754_v8, %s846_s16 }
 0xf84   :  { %v550_v1 = vpop.permute.xlu2 %549 }
 0xf85   :  { %v552_v2 = vmul.f32 %v550_v1, %v533_v60 }
 0xf87   :  { %556 = vrot.lane.b32.xlu0 %v552_v2, %s847_s3 }
 0xff9   :  { %v557_v3 = vpop.permute.xlu0 %556 }
 0xffa   :  { %686 = vmatmul.msk.f32.vlgmr.msra.gmra.mxu1 %vm101_vm5, %v557_v3 }
0x1077   :  { %v577_v5 = vpop.f32.mrf.mxu1 }
0x1078   :  { %v580_v6 = vadd.f32 %v577_v5, %v554_v4 }
0x107a   :  { %755 = vtanh.f32 %v580_v6  ;;  %v687_v9 = vmul.f32 -1.442695, %v580_v6 }
0x107c   :  { %757 = vpow2.f32 %v687_v9 }
0x1080   :  { %v756_v7 = vpop.eup %755 }
0x1081   :  { %603 = vrot.lane.b32.xlu1 %v756_v7, %s846_s16 }
0x1082   :  { %v758_v10 = vpop.eup %757 }
0x1083   :  { %v584_v11 = vadd.f32 1.0, %v758_v10 }
0x1085   :  { %759 = vrcp.f32 %v584_v11  ;;  %v596_v17 = vand.u32 2147483648, %v584_v11  ;;  %vm590_vm1 = vweird.f32 %v584_v11  ;;  %v594_v18 = vand.u32 2147483647, %v584_v11 }
0x1087   :  { %v597_v20 = vor.u32 1.1754944e-38, %v596_v17  ;;  %vm595_vm0 = vcmp.eq.f32.partialorder %v594_v18, 8.507059e+37 }
0x108b   :  { %v760_v12 = vpop.eup %759 }
0x108c   :  { %v586_v13 = vmul.f32 %v760_v12, %v584_v11  ;;  %vm591_vm15 = vweird.f32 %v760_v12 }
0x108d   :  { %vm592_vm2 = vmor %vm590_vm1, %vm591_vm15 }
0x108e   :  { %v587_v14 = vsub.f32 1.0, %v586_v13 }
0x1090   :  { %v588_v15 = vmul.f32 %v760_v12, %v587_v14 }
0x1092   :  { %v589_v16 = vadd.f32 %v760_v12, %v588_v15 }
0x1094   :  { %v593_v19 = vsel %vm592_vm2, %v760_v12, %v589_v16 }
0x1095   :  { %v598_v22 = vsel %vm595_vm0, %v597_v20, %v593_v19 }
0x1096   :  { %v601_v24 = vmul.f32 %v598_v22, %v546_v0 }
0x10f3   :  { %v604_v21 = vpop.permute.xlu1 %603 }
0x10f4   :  { %v606_v23 = vmul.f32 %v604_v21, %v598_v22 }
0x10f6   :  { %608 = vrot.lane.b32.xlu2 %v606_v23, %s847_s3 }
0x1150   :  { %v609_v25 = vpop.permute.xlu2 %608 }
0x1151   :  { %v611_v26 = vadd.f32 %v609_v25, %v601_v24 }
0x1153   :  { %761 = vtanh.f32 %v611_v26 }
0x1159   :  { %v762_v27 = vpop.eup %761 }
0x115a   :  { %614 = vrot.lane.b32.xlu0 %v762_v27, %s846_s16 }
0x11cc   :  { %v615_v32 = vpop.permute.xlu0 %614 }
0x11cd   :  { %v617_v33 = vmul.f32 %v615_v32, %v598_v22 }
0x11cf   :  { %627 = vrot.lane.b32.xlu1 %v617_v33, %s847_s3 }
0x1241   :  { %v628_v34 = vpop.permute.xlu1 %627 }
0x1242   :  { %688 = vmatmul.msk.f32.vlgmr.msra.gmra.mxu2 %vm101_vm5, %v628_v34 }
0x12c5   :  { %v648_v36 = vpop.f32.mrf.mxu2 }
0x12c6   :  { %v649_v37 = vadd.f32 %v698_v35, %v648_v36 }
0x12c8   :  { %652 = vst.msk [vmem:[#allocation8] sm:$0x3] %vm651_vm3, %v649_v37 }
0x12c9   :  { %663 = dma.vmem_to_hbm [thread:$0]  %s659_s28, 32, %s661_s7, [#allocation5]  }
0x12ca   :  { %839 = dma.done.wait [#allocation5], 32  }
0x12cb   :  { %840 = vsyncadd [#allocation5], 4294967264 }
0x12cc   :  { %668 = vsyncpa [#allocation4], 1 }
0x12cd   :  { %669 = vsyncpa [#allocation7], 1 }
0x12ce   :  { %670 = vsyncpa [#allocation5], 1 }

</bundles_post_ra>
